<compile_context>
chip_gen: v6e
topology: v6e:2x2x1
jax: 0.10.0
libtpu: 0.0.40
codegen_flags: <defaults>
</compile_context>

<pallas_src>
import math
from functools import partial

import jax
import jax.numpy as jnp
from jax.experimental import pallas as pl
from jax.experimental.pallas import tpu as pltpu

_LOG_EPS = math.log(1e-7)   # torch.clamp(probs, min=1e-7) == clamp of log-probs


def _multibox_kernel(yt_ref, lp_ref, cl_ref,
                     conf_loss_ref, pos_loc_loss_ref, maxc_ref):
    """Per-tile losses.

    yt_ref: (4+C+1, bt, nt) channel-major y_true tile
    lp_ref: (4,     bt, nt) loc regression tile
    cl_ref: (C,     bt, nt) class-logits tile
    Outputs (all (bt, nt), lane-dense):
      conf_loss_ref    : per-box softmax cross-entropy
      pos_loc_loss_ref : per-box smooth-L1, pre-masked by the positive flag
      maxc_ref         : sum of non-background probs, pre-masked to negatives
    """
    C = cl_ref.shape[0]
    pos = yt_ref[4 + C]                                   # (bt, nt)

    # ---- smooth L1 over the 4 box coordinates (unrolled VPU ops) ----
    loc_loss = jnp.zeros_like(pos)
    for c in range(4):
        d = yt_ref[c] - lp_ref[c]
        ad = jnp.abs(d)
        loc_loss = loc_loss + jnp.where(ad < 1.0, 0.5 * d * d, ad - 0.5)

    # ---- softmax cross-entropy in log-sum-exp form (no probs tensor) ----
    m = cl_ref[0]
    for c in range(1, C):
        m = jnp.maximum(m, cl_ref[c])
    e0 = jnp.exp(cl_ref[0] - m)                           # background class
    sum_e = e0
    for c in range(1, C):
        sum_e = sum_e + jnp.exp(cl_ref[c] - m)
    log_sum_e = jnp.log(sum_e)                            # 1 log per box (not per class)

    # conf_loss = -sum_c t_c * log(max(softmax_c, 1e-7))
    conf_loss = jnp.zeros_like(pos)
    for c in range(C):
        logp = (cl_ref[c] - m) - log_sum_e
        conf_loss = conf_loss - yt_ref[4 + c] * jnp.maximum(logp, _LOG_EPS)

    # sum of non-background class probabilities, masked to negatives only
    inv_sum_e = pl.reciprocal(sum_e, approx=False)
    max_confs = (sum_e - e0) * inv_sum_e                  # == sum_{c>=1} softmax_c

    conf_loss_ref[...] = conf_loss
    pos_loc_loss_ref[...] = loc_loss * pos
    maxc_ref[...] = max_confs * (1.0 - pos)


def multibox_loss(y_true, loc_pred, conf_logits, *, num_classes,
                  alpha=1.0, neg_pos_ratio=3.0, negatives_for_hard=100.0,
                  n_tile=512, b_tile=None, max_hard_negatives=None):
    """Forward pass of MultiboxLoss.

    y_true:      (B, N, 4 + num_classes + 1)  [loc | one-hot classes | pos]
    loc_pred:    (B, N, 4)                    == y_pred[0]
    conf_logits: (B, N, num_classes)          == y_pred[1]
    """
    B, N, D = y_true.shape
    C = num_classes
    assert D == 4 + C + 1

    f32 = jnp.float32
    y_true = y_true.astype(f32)
    loc_pred = loc_pred.astype(f32)
    conf_logits = conf_logits.astype(f32)

    # Layout plumbing: channel-major so boxes land on the lane axis.
    yt_t = jnp.transpose(y_true, (2, 0, 1))       # (D, B, N)
    lp_t = jnp.transpose(loc_pred, (2, 0, 1))     # (4, B, N)
    cl_t = jnp.transpose(conf_logits, (2, 0, 1))  # (C, B, N)

    # N on lanes in multiples of 128 (or the full extent for small N).
    if N <= n_tile:
        nt, n_pad = N, N
    else:
        assert n_tile % 128 == 0, "n_tile must be a multiple of 128"
        nt = n_tile
        n_pad = pl.cdiv(N, nt) * nt
        if n_pad != N:
            pad = [(0, 0), (0, 0), (0, n_pad - N)]
            yt_t = jnp.pad(yt_t, pad)
            lp_t = jnp.pad(lp_t, pad)
            cl_t = jnp.pad(cl_t, pad)

    # Batch tile: full batch (default) or a multiple of 8 sublanes.
    bt = B if b_tile is None else int(b_tile)
    assert bt == B or (bt % 8 == 0 and B % bt == 0)

    grid = (B // bt, n_pad // nt)
    out_shapes = tuple(jax.ShapeDtypeStruct((B, n_pad), f32) for _ in range(3))
    out_spec = pl.BlockSpec((bt, nt), lambda i, j: (i, j))

    conf_loss, pos_loc_loss, max_confs = pl.pallas_call(
        _multibox_kernel,
        out_shape=out_shapes,
        grid=grid,
        in_specs=[
            pl.BlockSpec((D, bt, nt), lambda i, j: (0, i, j)),
            pl.BlockSpec((4, bt, nt), lambda i, j: (0, i, j)),
            pl.BlockSpec((C, bt, nt), lambda i, j: (0, i, j)),
        ],
        out_specs=(out_spec, out_spec, out_spec),
        compiler_params=pltpu.CompilerParams(
            dimension_semantics=("parallel", "parallel"),
            # Per-step footprint is tiny (< a few MiB even at nt=2048, B=32);
            # keep an explicit limit with headroom below v7x's 64 MiB VMEM.
            vmem_limit_bytes=48 * 1024 * 1024),
    )(yt_t, lp_t, cl_t)

    # Drop N padding.
    conf_loss = conf_loss[:, :N]
    pos_loc_loss_map = pos_loc_loss[:, :N]
    max_confs = max_confs[:, :N]

    # Cheap per-batch reductions in glue (conf_loss / max_confs are needed at
    # full resolution for hard-negative mining anyway).
    pos = yt_t[D - 1, :, :N]                      # (B, N) positive indicator
    num_pos = jnp.sum(pos, axis=-1)               # (B,)
    pos_conf_loss = jnp.sum(conf_loss * pos)
    pos_loc_loss = jnp.sum(pos_loc_loss_map)

    num_neg = jnp.minimum(neg_pos_ratio * num_pos, N - num_pos)
    has_min = jnp.sum((num_neg > 0).astype(f32))
    num_neg_batch = jnp.where(has_min > 0, jnp.sum(num_neg),
                              jnp.float32(negatives_for_hard))
    k = num_neg_batch.astype(jnp.int32)

    # Hard-negative mining with a bounded (static) top-k instead of a full
    # B*N argsort.  Safe static bound: sum_b min(r*p_b, N-p_b) <= B*N*r/(r+1).
    safe_kmax = int(math.ceil(B * N * neg_pos_ratio / (1.0 + neg_pos_ratio)))
    safe_kmax = max(safe_kmax, int(math.ceil(negatives_for_hard)), 1)
    kmax = safe_kmax if max_hard_negatives is None else int(max_hard_negatives)
    kmax = min(kmax, B * N)
    k = jnp.minimum(k, jnp.int32(kmax))
    # TODO(synk): tie-breaking among equal max_confs values may differ from
    # torch.topk ordering (summed loss is identical unless ties straddle k).
    _, top_idx = jax.lax.top_k(max_confs.reshape(-1), kmax)
    neg_losses = conf_loss.reshape(-1)[top_idx]
    neg_conf_loss = jnp.sum(jnp.where(jnp.arange(kmax) < k, neg_losses, 0.0))

    num_pos_safe = jnp.where(num_pos != 0, num_pos, jnp.ones_like(num_pos))
    total = pos_conf_loss + neg_conf_loss + alpha * pos_loc_loss
    return total / jnp.sum(num_pos_safe)


def _reference_loss(y_true, loc_pred, conf_logits, num_classes,
                    alpha=1.0, neg_pos_ratio=3.0, negatives_for_hard=100.0):
    """Pure-JAX (eager) transcription of the PyTorch forward, for validation."""
    B, N, _ = y_true.shape
    probs = jax.nn.softmax(conf_logits, axis=-1)
    y_pred = jnp.concatenate([loc_pred, probs], axis=-1)
    conf_loss = -jnp.sum(
        y_true[:, :, 4:-1] * jnp.log(jnp.maximum(y_pred[:, :, 4:], 1e-7)),
        axis=-1)
    diff = y_true[:, :, :4] - y_pred[:, :, :4]
    ad = jnp.abs(diff)
    loc_loss = jnp.sum(jnp.where(ad < 1.0, 0.5 * diff ** 2, ad - 0.5), axis=-1)
    pos = y_true[:, :, -1]
    pos_loc = jnp.sum(loc_loss * pos, axis=1)
    pos_conf = jnp.sum(conf_loss * pos, axis=1)
    num_pos = jnp.sum(pos, axis=-1)
    num_neg = jnp.minimum(neg_pos_ratio * num_pos, N - num_pos)
    has_min = jnp.sum(num_neg > 0)
    num_neg_batch = jnp.where(has_min > 0, jnp.sum(num_neg),
                              jnp.float32(negatives_for_hard))
    confs_start, confs_end = 5, 4 + num_classes
    max_confs = jnp.sum(y_pred[:, :, confs_start:confs_end], axis=2)
    max_confs = (max_confs * (1 - pos)).reshape(-1)
    kk = int(num_neg_batch)
    _, idx = jax.lax.top_k(max_confs, kk)
    neg_conf = jnp.sum(conf_loss.reshape(-1)[idx])
    num_pos = jnp.where(num_pos != 0, num_pos, jnp.ones_like(num_pos))
    total = jnp.sum(pos_conf) + neg_conf + alpha * jnp.sum(pos_loc)
    return total / jnp.sum(num_pos)


if __name__ == "__main__":
    B, N, C = 2, 512, 8            # batch, num_priors (boxes), num_classes

    key = jax.random.PRNGKey(0)
    k1, k2, k3, k4 = jax.random.split(key, 4)

    # y_true consistent with SSD targets: 4 loc offsets, one-hot class
    # (class 0 = background), positive-match indicator in the last slot.
    labels = jax.random.randint(k1, (B, N), 0, C)
    conf_true = jax.nn.one_hot(labels, C, dtype=jnp.float32)
    pos_ind = (labels != 0).astype(jnp.float32)[..., None]
    loc_true = jax.random.normal(k2, (B, N, 4), dtype=jnp.float32)
    y_true = jnp.concatenate([loc_true, conf_true, pos_ind], axis=-1)

    # y_pred = (loc regression, class logits) — what the SSD head would emit.
    loc_pred = jax.random.normal(k3, (B, N, 4), dtype=jnp.float32)
    conf_logits = jax.random.normal(k4, (B, N, C), dtype=jnp.float32)

    loss_fn = jax.jit(partial(multibox_loss, num_classes=C, n_tile=256))
    loss = jax.block_until_ready(loss_fn(y_true, loc_pred, conf_logits))

    ref = _reference_loss(y_true, loc_pred, conf_logits, C)
    assert jnp.isfinite(loss), "non-finite loss"
    assert jnp.allclose(loss, ref, rtol=1e-4, atol=1e-4), (loss, ref)

    print("KERNEL_OK")
</pallas_src>

<mosaic_0001>
module attributes {stable_mosaic.version = 11 : i64} {
  func.func @_multibox_kernel(%arg0: i32, %arg1: i32, %arg2: memref<13x2x256xf32, #tpu.memory_space<vmem>>, %arg3: memref<4x2x256xf32, #tpu.memory_space<vmem>>, %arg4: memref<8x2x256xf32, #tpu.memory_space<vmem>>, %arg5: memref<2x256xf32, #tpu.memory_space<vmem>>, %arg6: memref<2x256xf32, #tpu.memory_space<vmem>>, %arg7: memref<2x256xf32, #tpu.memory_space<vmem>>) attributes {dimension_semantics = [#tpu.dimension_semantics<parallel>, #tpu.dimension_semantics<parallel>], iteration_bounds = array<i64: 1, 2>, scalar_prefetch = 0 : i64, scratch_operands = 0 : i64, tpu.core_type = #tpu.core_type<tc>, window_params = [{transform_indices = @transform_0, window_bounds = array<i64: 13, 2, 256>}, {transform_indices = @transform_1, window_bounds = array<i64: 4, 2, 256>}, {transform_indices = @transform_2, window_bounds = array<i64: 8, 2, 256>}, {transform_indices = @transform_3, window_bounds = array<i64: 2, 256>}, {transform_indices = @transform_4, window_bounds = array<i64: 2, 256>}, {transform_indices = @transform_5, window_bounds = array<i64: 2, 256>}]} {
    %c12 = arith.constant 12 : index
    %c0 = arith.constant 0 : index
    %c0_0 = arith.constant 0 : index
    %0 = vector.load %arg2[%c12, %c0, %c0_0] : memref<13x2x256xf32, #tpu.memory_space<vmem>>, vector<1x2x256xf32>
    %1 = vector.shape_cast %0 : vector<1x2x256xf32> to vector<2x256xf32>
    %cst = arith.constant 0.000000e+00 : f32
    %2 = vector.broadcast %cst : f32 to vector<2x256xf32>
    %c0_1 = arith.constant 0 : index
    %c0_2 = arith.constant 0 : index
    %c0_3 = arith.constant 0 : index
    %3 = vector.load %arg2[%c0_1, %c0_2, %c0_3] : memref<13x2x256xf32, #tpu.memory_space<vmem>>, vector<1x2x256xf32>
    %4 = vector.shape_cast %3 : vector<1x2x256xf32> to vector<2x256xf32>
    %c0_4 = arith.constant 0 : index
    %c0_5 = arith.constant 0 : index
    %c0_6 = arith.constant 0 : index
    %5 = vector.load %arg3[%c0_4, %c0_5, %c0_6] : memref<4x2x256xf32, #tpu.memory_space<vmem>>, vector<1x2x256xf32>
    %6 = vector.shape_cast %5 : vector<1x2x256xf32> to vector<2x256xf32>
    %7 = arith.subf %4, %6 : vector<2x256xf32>
    %8 = math.absf %7 : vector<2x256xf32>
    %cst_7 = arith.constant 1.000000e+00 : f32
    %9 = vector.broadcast %cst_7 : f32 to vector<2x256xf32>
    %10 = arith.cmpf olt, %8, %9 : vector<2x256xf32>
    %cst_8 = arith.constant 5.000000e-01 : f32
    %11 = vector.broadcast %cst_8 : f32 to vector<2x256xf32>
    %12 = arith.mulf %11, %7 : vector<2x256xf32>
    %13 = arith.mulf %12, %7 : vector<2x256xf32>
    %cst_9 = arith.constant 5.000000e-01 : f32
    %14 = vector.broadcast %cst_9 : f32 to vector<2x256xf32>
    %15 = arith.subf %8, %14 : vector<2x256xf32>
    %16 = arith.select %10, %13, %15 : vector<2x256xi1>, vector<2x256xf32>
    %17 = arith.addf %2, %16 : vector<2x256xf32>
    %c1 = arith.constant 1 : index
    %c0_10 = arith.constant 0 : index
    %c0_11 = arith.constant 0 : index
    %18 = vector.load %arg2[%c1, %c0_10, %c0_11] : memref<13x2x256xf32, #tpu.memory_space<vmem>>, vector<1x2x256xf32>
    %19 = vector.shape_cast %18 : vector<1x2x256xf32> to vector<2x256xf32>
    %c1_12 = arith.constant 1 : index
    %c0_13 = arith.constant 0 : index
    %c0_14 = arith.constant 0 : index
    %20 = vector.load %arg3[%c1_12, %c0_13, %c0_14] : memref<4x2x256xf32, #tpu.memory_space<vmem>>, vector<1x2x256xf32>
    %21 = vector.shape_cast %20 : vector<1x2x256xf32> to vector<2x256xf32>
    %22 = arith.subf %19, %21 : vector<2x256xf32>
    %23 = math.absf %22 : vector<2x256xf32>
    %cst_15 = arith.constant 1.000000e+00 : f32
    %24 = vector.broadcast %cst_15 : f32 to vector<2x256xf32>
    %25 = arith.cmpf olt, %23, %24 : vector<2x256xf32>
    %cst_16 = arith.constant 5.000000e-01 : f32
    %26 = vector.broadcast %cst_16 : f32 to vector<2x256xf32>
    %27 = arith.mulf %26, %22 : vector<2x256xf32>
    %28 = arith.mulf %27, %22 : vector<2x256xf32>
    %cst_17 = arith.constant 5.000000e-01 : f32
    %29 = vector.broadcast %cst_17 : f32 to vector<2x256xf32>
    %30 = arith.subf %23, %29 : vector<2x256xf32>
    %31 = arith.select %25, %28, %30 : vector<2x256xi1>, vector<2x256xf32>
    %32 = arith.addf %17, %31 : vector<2x256xf32>
    %c2 = arith.constant 2 : index
    %c0_18 = arith.constant 0 : index
    %c0_19 = arith.constant 0 : index
    %33 = vector.load %arg2[%c2, %c0_18, %c0_19] : memref<13x2x256xf32, #tpu.memory_space<vmem>>, vector<1x2x256xf32>
    %34 = vector.shape_cast %33 : vector<1x2x256xf32> to vector<2x256xf32>
    %c2_20 = arith.constant 2 : index
    %c0_21 = arith.constant 0 : index
    %c0_22 = arith.constant 0 : index
    %35 = vector.load %arg3[%c2_20, %c0_21, %c0_22] : memref<4x2x256xf32, #tpu.memory_space<vmem>>, vector<1x2x256xf32>
    %36 = vector.shape_cast %35 : vector<1x2x256xf32> to vector<2x256xf32>
    %37 = arith.subf %34, %36 : vector<2x256xf32>
    %38 = math.absf %37 : vector<2x256xf32>
    %cst_23 = arith.constant 1.000000e+00 : f32
    %39 = vector.broadcast %cst_23 : f32 to vector<2x256xf32>
    %40 = arith.cmpf olt, %38, %39 : vector<2x256xf32>
    %cst_24 = arith.constant 5.000000e-01 : f32
    %41 = vector.broadcast %cst_24 : f32 to vector<2x256xf32>
    %42 = arith.mulf %41, %37 : vector<2x256xf32>
    %43 = arith.mulf %42, %37 : vector<2x256xf32>
    %cst_25 = arith.constant 5.000000e-01 : f32
    %44 = vector.broadcast %cst_25 : f32 to vector<2x256xf32>
    %45 = arith.subf %38, %44 : vector<2x256xf32>
    %46 = arith.select %40, %43, %45 : vector<2x256xi1>, vector<2x256xf32>
    %47 = arith.addf %32, %46 : vector<2x256xf32>
    %c3 = arith.constant 3 : index
    %c0_26 = arith.constant 0 : index
    %c0_27 = arith.constant 0 : index
    %48 = vector.load %arg2[%c3, %c0_26, %c0_27] : memref<13x2x256xf32, #tpu.memory_space<vmem>>, vector<1x2x256xf32>
    %49 = vector.shape_cast %48 : vector<1x2x256xf32> to vector<2x256xf32>
    %c3_28 = arith.constant 3 : index
    %c0_29 = arith.constant 0 : index
    %c0_30 = arith.constant 0 : index
    %50 = vector.load %arg3[%c3_28, %c0_29, %c0_30] : memref<4x2x256xf32, #tpu.memory_space<vmem>>, vector<1x2x256xf32>
    %51 = vector.shape_cast %50 : vector<1x2x256xf32> to vector<2x256xf32>
    %52 = arith.subf %49, %51 : vector<2x256xf32>
    %53 = math.absf %52 : vector<2x256xf32>
    %cst_31 = arith.constant 1.000000e+00 : f32
    %54 = vector.broadcast %cst_31 : f32 to vector<2x256xf32>
    %55 = arith.cmpf olt, %53, %54 : vector<2x256xf32>
    %cst_32 = arith.constant 5.000000e-01 : f32
    %56 = vector.broadcast %cst_32 : f32 to vector<2x256xf32>
    %57 = arith.mulf %56, %52 : vector<2x256xf32>
    %58 = arith.mulf %57, %52 : vector<2x256xf32>
    %cst_33 = arith.constant 5.000000e-01 : f32
    %59 = vector.broadcast %cst_33 : f32 to vector<2x256xf32>
    %60 = arith.subf %53, %59 : vector<2x256xf32>
    %61 = arith.select %55, %58, %60 : vector<2x256xi1>, vector<2x256xf32>
    %62 = arith.addf %47, %61 : vector<2x256xf32>
    %c0_34 = arith.constant 0 : index
    %c0_35 = arith.constant 0 : index
    %c0_36 = arith.constant 0 : index
    %63 = vector.load %arg4[%c0_34, %c0_35, %c0_36] : memref<8x2x256xf32, #tpu.memory_space<vmem>>, vector<1x2x256xf32>
    %64 = vector.shape_cast %63 : vector<1x2x256xf32> to vector<2x256xf32>
    %c1_37 = arith.constant 1 : index
    %c0_38 = arith.constant 0 : index
    %c0_39 = arith.constant 0 : index
    %65 = vector.load %arg4[%c1_37, %c0_38, %c0_39] : memref<8x2x256xf32, #tpu.memory_space<vmem>>, vector<1x2x256xf32>
    %66 = vector.shape_cast %65 : vector<1x2x256xf32> to vector<2x256xf32>
    %67 = arith.maximumf %64, %66 : vector<2x256xf32>
    %c2_40 = arith.constant 2 : index
    %c0_41 = arith.constant 0 : index
    %c0_42 = arith.constant 0 : index
    %68 = vector.load %arg4[%c2_40, %c0_41, %c0_42] : memref<8x2x256xf32, #tpu.memory_space<vmem>>, vector<1x2x256xf32>
    %69 = vector.shape_cast %68 : vector<1x2x256xf32> to vector<2x256xf32>
    %70 = arith.maximumf %67, %69 : vector<2x256xf32>
    %c3_43 = arith.constant 3 : index
    %c0_44 = arith.constant 0 : index
    %c0_45 = arith.constant 0 : index
    %71 = vector.load %arg4[%c3_43, %c0_44, %c0_45] : memref<8x2x256xf32, #tpu.memory_space<vmem>>, vector<1x2x256xf32>
    %72 = vector.shape_cast %71 : vector<1x2x256xf32> to vector<2x256xf32>
    %73 = arith.maximumf %70, %72 : vector<2x256xf32>
    %c4 = arith.constant 4 : index
    %c0_46 = arith.constant 0 : index
    %c0_47 = arith.constant 0 : index
    %74 = vector.load %arg4[%c4, %c0_46, %c0_47] : memref<8x2x256xf32, #tpu.memory_space<vmem>>, vector<1x2x256xf32>
    %75 = vector.shape_cast %74 : vector<1x2x256xf32> to vector<2x256xf32>
    %76 = arith.maximumf %73, %75 : vector<2x256xf32>
    %c5 = arith.constant 5 : index
    %c0_48 = arith.constant 0 : index
    %c0_49 = arith.constant 0 : index
    %77 = vector.load %arg4[%c5, %c0_48, %c0_49] : memref<8x2x256xf32, #tpu.memory_space<vmem>>, vector<1x2x256xf32>
    %78 = vector.shape_cast %77 : vector<1x2x256xf32> to vector<2x256xf32>
    %79 = arith.maximumf %76, %78 : vector<2x256xf32>
    %c6 = arith.constant 6 : index
    %c0_50 = arith.constant 0 : index
    %c0_51 = arith.constant 0 : index
    %80 = vector.load %arg4[%c6, %c0_50, %c0_51] : memref<8x2x256xf32, #tpu.memory_space<vmem>>, vector<1x2x256xf32>
    %81 = vector.shape_cast %80 : vector<1x2x256xf32> to vector<2x256xf32>
    %82 = arith.maximumf %79, %81 : vector<2x256xf32>
    %c7 = arith.constant 7 : index
    %c0_52 = arith.constant 0 : index
    %c0_53 = arith.constant 0 : index
    %83 = vector.load %arg4[%c7, %c0_52, %c0_53] : memref<8x2x256xf32, #tpu.memory_space<vmem>>, vector<1x2x256xf32>
    %84 = vector.shape_cast %83 : vector<1x2x256xf32> to vector<2x256xf32>
    %85 = arith.maximumf %82, %84 : vector<2x256xf32>
    %c0_54 = arith.constant 0 : index
    %c0_55 = arith.constant 0 : index
    %c0_56 = arith.constant 0 : index
    %86 = vector.load %arg4[%c0_54, %c0_55, %c0_56] : memref<8x2x256xf32, #tpu.memory_space<vmem>>, vector<1x2x256xf32>
    %87 = vector.shape_cast %86 : vector<1x2x256xf32> to vector<2x256xf32>
    %88 = arith.subf %87, %85 : vector<2x256xf32>
    %89 = math.exp %88 : vector<2x256xf32>
    %c1_57 = arith.constant 1 : index
    %c0_58 = arith.constant 0 : index
    %c0_59 = arith.constant 0 : index
    %90 = vector.load %arg4[%c1_57, %c0_58, %c0_59] : memref<8x2x256xf32, #tpu.memory_space<vmem>>, vector<1x2x256xf32>
    %91 = vector.shape_cast %90 : vector<1x2x256xf32> to vector<2x256xf32>
    %92 = arith.subf %91, %85 : vector<2x256xf32>
    %93 = math.exp %92 : vector<2x256xf32>
    %94 = arith.addf %89, %93 : vector<2x256xf32>
    %c2_60 = arith.constant 2 : index
    %c0_61 = arith.constant 0 : index
    %c0_62 = arith.constant 0 : index
    %95 = vector.load %arg4[%c2_60, %c0_61, %c0_62] : memref<8x2x256xf32, #tpu.memory_space<vmem>>, vector<1x2x256xf32>
    %96 = vector.shape_cast %95 : vector<1x2x256xf32> to vector<2x256xf32>
    %97 = arith.subf %96, %85 : vector<2x256xf32>
    %98 = math.exp %97 : vector<2x256xf32>
    %99 = arith.addf %94, %98 : vector<2x256xf32>
    %c3_63 = arith.constant 3 : index
    %c0_64 = arith.constant 0 : index
    %c0_65 = arith.constant 0 : index
    %100 = vector.load %arg4[%c3_63, %c0_64, %c0_65] : memref<8x2x256xf32, #tpu.memory_space<vmem>>, vector<1x2x256xf32>
    %101 = vector.shape_cast %100 : vector<1x2x256xf32> to vector<2x256xf32>
    %102 = arith.subf %101, %85 : vector<2x256xf32>
    %103 = math.exp %102 : vector<2x256xf32>
    %104 = arith.addf %99, %103 : vector<2x256xf32>
    %c4_66 = arith.constant 4 : index
    %c0_67 = arith.constant 0 : index
    %c0_68 = arith.constant 0 : index
    %105 = vector.load %arg4[%c4_66, %c0_67, %c0_68] : memref<8x2x256xf32, #tpu.memory_space<vmem>>, vector<1x2x256xf32>
    %106 = vector.shape_cast %105 : vector<1x2x256xf32> to vector<2x256xf32>
    %107 = arith.subf %106, %85 : vector<2x256xf32>
    %108 = math.exp %107 : vector<2x256xf32>
    %109 = arith.addf %104, %108 : vector<2x256xf32>
    %c5_69 = arith.constant 5 : index
    %c0_70 = arith.constant 0 : index
    %c0_71 = arith.constant 0 : index
    %110 = vector.load %arg4[%c5_69, %c0_70, %c0_71] : memref<8x2x256xf32, #tpu.memory_space<vmem>>, vector<1x2x256xf32>
    %111 = vector.shape_cast %110 : vector<1x2x256xf32> to vector<2x256xf32>
    %112 = arith.subf %111, %85 : vector<2x256xf32>
    %113 = math.exp %112 : vector<2x256xf32>
    %114 = arith.addf %109, %113 : vector<2x256xf32>
    %c6_72 = arith.constant 6 : index
    %c0_73 = arith.constant 0 : index
    %c0_74 = arith.constant 0 : index
    %115 = vector.load %arg4[%c6_72, %c0_73, %c0_74] : memref<8x2x256xf32, #tpu.memory_space<vmem>>, vector<1x2x256xf32>
    %116 = vector.shape_cast %115 : vector<1x2x256xf32> to vector<2x256xf32>
    %117 = arith.subf %116, %85 : vector<2x256xf32>
    %118 = math.exp %117 : vector<2x256xf32>
    %119 = arith.addf %114, %118 : vector<2x256xf32>
    %c7_75 = arith.constant 7 : index
    %c0_76 = arith.constant 0 : index
    %c0_77 = arith.constant 0 : index
    %120 = vector.load %arg4[%c7_75, %c0_76, %c0_77] : memref<8x2x256xf32, #tpu.memory_space<vmem>>, vector<1x2x256xf32>
    %121 = vector.shape_cast %120 : vector<1x2x256xf32> to vector<2x256xf32>
    %122 = arith.subf %121, %85 : vector<2x256xf32>
    %123 = math.exp %122 : vector<2x256xf32>
    %124 = arith.addf %119, %123 : vector<2x256xf32>
    %125 = math.log %124 : vector<2x256xf32>
    %cst_78 = arith.constant 0.000000e+00 : f32
    %126 = vector.broadcast %cst_78 : f32 to vector<2x256xf32>
    %c0_79 = arith.constant 0 : index
    %c0_80 = arith.constant 0 : index
    %c0_81 = arith.constant 0 : index
    %127 = vector.load %arg4[%c0_79, %c0_80, %c0_81] : memref<8x2x256xf32, #tpu.memory_space<vmem>>, vector<1x2x256xf32>
    %128 = vector.shape_cast %127 : vector<1x2x256xf32> to vector<2x256xf32>
    %129 = arith.subf %128, %85 : vector<2x256xf32>
    %130 = arith.subf %129, %125 : vector<2x256xf32>
    %c4_82 = arith.constant 4 : index
    %c0_83 = arith.constant 0 : index
    %c0_84 = arith.constant 0 : index
    %131 = vector.load %arg2[%c4_82, %c0_83, %c0_84] : memref<13x2x256xf32, #tpu.memory_space<vmem>>, vector<1x2x256xf32>
    %132 = vector.shape_cast %131 : vector<1x2x256xf32> to vector<2x256xf32>
    %cst_85 = arith.constant -16.1180954 : f32
    %133 = vector.broadcast %cst_85 : f32 to vector<2x256xf32>
    %134 = arith.maximumf %130, %133 : vector<2x256xf32>
    %135 = arith.mulf %132, %134 : vector<2x256xf32>
    %136 = arith.subf %126, %135 : vector<2x256xf32>
    %c1_86 = arith.constant 1 : index
    %c0_87 = arith.constant 0 : index
    %c0_88 = arith.constant 0 : index
    %137 = vector.load %arg4[%c1_86, %c0_87, %c0_88] : memref<8x2x256xf32, #tpu.memory_space<vmem>>, vector<1x2x256xf32>
    %138 = vector.shape_cast %137 : vector<1x2x256xf32> to vector<2x256xf32>
    %139 = arith.subf %138, %85 : vector<2x256xf32>
    %140 = arith.subf %139, %125 : vector<2x256xf32>
    %c5_89 = arith.constant 5 : index
    %c0_90 = arith.constant 0 : index
    %c0_91 = arith.constant 0 : index
    %141 = vector.load %arg2[%c5_89, %c0_90, %c0_91] : memref<13x2x256xf32, #tpu.memory_space<vmem>>, vector<1x2x256xf32>
    %142 = vector.shape_cast %141 : vector<1x2x256xf32> to vector<2x256xf32>
    %cst_92 = arith.constant -16.1180954 : f32
    %143 = vector.broadcast %cst_92 : f32 to vector<2x256xf32>
    %144 = arith.maximumf %140, %143 : vector<2x256xf32>
    %145 = arith.mulf %142, %144 : vector<2x256xf32>
    %146 = arith.subf %136, %145 : vector<2x256xf32>
    %c2_93 = arith.constant 2 : index
    %c0_94 = arith.constant 0 : index
    %c0_95 = arith.constant 0 : index
    %147 = vector.load %arg4[%c2_93, %c0_94, %c0_95] : memref<8x2x256xf32, #tpu.memory_space<vmem>>, vector<1x2x256xf32>
    %148 = vector.shape_cast %147 : vector<1x2x256xf32> to vector<2x256xf32>
    %149 = arith.subf %148, %85 : vector<2x256xf32>
    %150 = arith.subf %149, %125 : vector<2x256xf32>
    %c6_96 = arith.constant 6 : index
    %c0_97 = arith.constant 0 : index
    %c0_98 = arith.constant 0 : index
    %151 = vector.load %arg2[%c6_96, %c0_97, %c0_98] : memref<13x2x256xf32, #tpu.memory_space<vmem>>, vector<1x2x256xf32>
    %152 = vector.shape_cast %151 : vector<1x2x256xf32> to vector<2x256xf32>
    %cst_99 = arith.constant -16.1180954 : f32
    %153 = vector.broadcast %cst_99 : f32 to vector<2x256xf32>
    %154 = arith.maximumf %150, %153 : vector<2x256xf32>
    %155 = arith.mulf %152, %154 : vector<2x256xf32>
    %156 = arith.subf %146, %155 : vector<2x256xf32>
    %c3_100 = arith.constant 3 : index
    %c0_101 = arith.constant 0 : index
    %c0_102 = arith.constant 0 : index
    %157 = vector.load %arg4[%c3_100, %c0_101, %c0_102] : memref<8x2x256xf32, #tpu.memory_space<vmem>>, vector<1x2x256xf32>
    %158 = vector.shape_cast %157 : vector<1x2x256xf32> to vector<2x256xf32>
    %159 = arith.subf %158, %85 : vector<2x256xf32>
    %160 = arith.subf %159, %125 : vector<2x256xf32>
    %c7_103 = arith.constant 7 : index
    %c0_104 = arith.constant 0 : index
    %c0_105 = arith.constant 0 : index
    %161 = vector.load %arg2[%c7_103, %c0_104, %c0_105] : memref<13x2x256xf32, #tpu.memory_space<vmem>>, vector<1x2x256xf32>
    %162 = vector.shape_cast %161 : vector<1x2x256xf32> to vector<2x256xf32>
    %cst_106 = arith.constant -16.1180954 : f32
    %163 = vector.broadcast %cst_106 : f32 to vector<2x256xf32>
    %164 = arith.maximumf %160, %163 : vector<2x256xf32>
    %165 = arith.mulf %162, %164 : vector<2x256xf32>
    %166 = arith.subf %156, %165 : vector<2x256xf32>
    %c4_107 = arith.constant 4 : index
    %c0_108 = arith.constant 0 : index
    %c0_109 = arith.constant 0 : index
    %167 = vector.load %arg4[%c4_107, %c0_108, %c0_109] : memref<8x2x256xf32, #tpu.memory_space<vmem>>, vector<1x2x256xf32>
    %168 = vector.shape_cast %167 : vector<1x2x256xf32> to vector<2x256xf32>
    %169 = arith.subf %168, %85 : vector<2x256xf32>
    %170 = arith.subf %169, %125 : vector<2x256xf32>
    %c8 = arith.constant 8 : index
    %c0_110 = arith.constant 0 : index
    %c0_111 = arith.constant 0 : index
    %171 = vector.load %arg2[%c8, %c0_110, %c0_111] : memref<13x2x256xf32, #tpu.memory_space<vmem>>, vector<1x2x256xf32>
    %172 = vector.shape_cast %171 : vector<1x2x256xf32> to vector<2x256xf32>
    %cst_112 = arith.constant -16.1180954 : f32
    %173 = vector.broadcast %cst_112 : f32 to vector<2x256xf32>
    %174 = arith.maximumf %170, %173 : vector<2x256xf32>
    %175 = arith.mulf %172, %174 : vector<2x256xf32>
    %176 = arith.subf %166, %175 : vector<2x256xf32>
    %c5_113 = arith.constant 5 : index
    %c0_114 = arith.constant 0 : index
    %c0_115 = arith.constant 0 : index
    %177 = vector.load %arg4[%c5_113, %c0_114, %c0_115] : memref<8x2x256xf32, #tpu.memory_space<vmem>>, vector<1x2x256xf32>
    %178 = vector.shape_cast %177 : vector<1x2x256xf32> to vector<2x256xf32>
    %179 = arith.subf %178, %85 : vector<2x256xf32>
    %180 = arith.subf %179, %125 : vector<2x256xf32>
    %c9 = arith.constant 9 : index
    %c0_116 = arith.constant 0 : index
    %c0_117 = arith.constant 0 : index
    %181 = vector.load %arg2[%c9, %c0_116, %c0_117] : memref<13x2x256xf32, #tpu.memory_space<vmem>>, vector<1x2x256xf32>
    %182 = vector.shape_cast %181 : vector<1x2x256xf32> to vector<2x256xf32>
    %cst_118 = arith.constant -16.1180954 : f32
    %183 = vector.broadcast %cst_118 : f32 to vector<2x256xf32>
    %184 = arith.maximumf %180, %183 : vector<2x256xf32>
    %185 = arith.mulf %182, %184 : vector<2x256xf32>
    %186 = arith.subf %176, %185 : vector<2x256xf32>
    %c6_119 = arith.constant 6 : index
    %c0_120 = arith.constant 0 : index
    %c0_121 = arith.constant 0 : index
    %187 = vector.load %arg4[%c6_119, %c0_120, %c0_121] : memref<8x2x256xf32, #tpu.memory_space<vmem>>, vector<1x2x256xf32>
    %188 = vector.shape_cast %187 : vector<1x2x256xf32> to vector<2x256xf32>
    %189 = arith.subf %188, %85 : vector<2x256xf32>
    %190 = arith.subf %189, %125 : vector<2x256xf32>
    %c10 = arith.constant 10 : index
    %c0_122 = arith.constant 0 : index
    %c0_123 = arith.constant 0 : index
    %191 = vector.load %arg2[%c10, %c0_122, %c0_123] : memref<13x2x256xf32, #tpu.memory_space<vmem>>, vector<1x2x256xf32>
    %192 = vector.shape_cast %191 : vector<1x2x256xf32> to vector<2x256xf32>
    %cst_124 = arith.constant -16.1180954 : f32
    %193 = vector.broadcast %cst_124 : f32 to vector<2x256xf32>
    %194 = arith.maximumf %190, %193 : vector<2x256xf32>
    %195 = arith.mulf %192, %194 : vector<2x256xf32>
    %196 = arith.subf %186, %195 : vector<2x256xf32>
    %c7_125 = arith.constant 7 : index
    %c0_126 = arith.constant 0 : index
    %c0_127 = arith.constant 0 : index
    %197 = vector.load %arg4[%c7_125, %c0_126, %c0_127] : memref<8x2x256xf32, #tpu.memory_space<vmem>>, vector<1x2x256xf32>
    %198 = vector.shape_cast %197 : vector<1x2x256xf32> to vector<2x256xf32>
    %199 = arith.subf %198, %85 : vector<2x256xf32>
    %200 = arith.subf %199, %125 : vector<2x256xf32>
    %c11 = arith.constant 11 : index
    %c0_128 = arith.constant 0 : index
    %c0_129 = arith.constant 0 : index
    %201 = vector.load %arg2[%c11, %c0_128, %c0_129] : memref<13x2x256xf32, #tpu.memory_space<vmem>>, vector<1x2x256xf32>
    %202 = vector.shape_cast %201 : vector<1x2x256xf32> to vector<2x256xf32>
    %cst_130 = arith.constant -16.1180954 : f32
    %203 = vector.broadcast %cst_130 : f32 to vector<2x256xf32>
    %204 = arith.maximumf %200, %203 : vector<2x256xf32>
    %205 = arith.mulf %202, %204 : vector<2x256xf32>
    %206 = arith.subf %196, %205 : vector<2x256xf32>
    %207 = tpu.reciprocal %124 : vector<2x256xf32> -> vector<2x256xf32>
    %208 = arith.subf %124, %89 : vector<2x256xf32>
    %209 = arith.mulf %208, %207 : vector<2x256xf32>
    %c0_131 = arith.constant 0 : index
    %c0_132 = arith.constant 0 : index
    %210 = vector.load %arg5[%c0_131, %c0_132] : memref<2x256xf32, #tpu.memory_space<vmem>>, vector<2x256xf32>
    tpu.vector_store %arg5[%c0_131, %c0_132], %206 {strides = array<i32>} : memref<2x256xf32, #tpu.memory_space<vmem>>, vector<2x256xf32>,
    %211 = arith.mulf %62, %1 : vector<2x256xf32>
    %c0_133 = arith.constant 0 : index
    %c0_134 = arith.constant 0 : index
    %212 = vector.load %arg6[%c0_133, %c0_134] : memref<2x256xf32, #tpu.memory_space<vmem>>, vector<2x256xf32>
    tpu.vector_store %arg6[%c0_133, %c0_134], %211 {strides = array<i32>} : memref<2x256xf32, #tpu.memory_space<vmem>>, vector<2x256xf32>,
    %cst_135 = arith.constant 1.000000e+00 : f32
    %213 = vector.broadcast %cst_135 : f32 to vector<2x256xf32>
    %214 = arith.subf %213, %1 : vector<2x256xf32>
    %215 = arith.mulf %209, %214 : vector<2x256xf32>
    %c0_136 = arith.constant 0 : index
    %c0_137 = arith.constant 0 : index
    %216 = vector.load %arg7[%c0_136, %c0_137] : memref<2x256xf32, #tpu.memory_space<vmem>>, vector<2x256xf32>
    tpu.vector_store %arg7[%c0_136, %c0_137], %215 {strides = array<i32>} : memref<2x256xf32, #tpu.memory_space<vmem>>, vector<2x256xf32>,
    return
  }
  func.func @transform_0(%arg0: i32, %arg1: i32) -> (i32, i32, i32) {
    %c0_i32 = arith.constant 0 : i32
    %c0_i32_0 = arith.constant 0 : i32
    return %c0_i32, %arg0, %arg1 : i32, i32, i32
  }
  func.func @transform_1(%arg0: i32, %arg1: i32) -> (i32, i32, i32) {
    %c0_i32 = arith.constant 0 : i32
    %c0_i32_0 = arith.constant 0 : i32
    return %c0_i32, %arg0, %arg1 : i32, i32, i32
  }
  func.func @transform_2(%arg0: i32, %arg1: i32) -> (i32, i32, i32) {
    %c0_i32 = arith.constant 0 : i32
    %c0_i32_0 = arith.constant 0 : i32
    return %c0_i32, %arg0, %arg1 : i32, i32, i32
  }
  func.func @transform_3(%arg0: i32, %arg1: i32) -> (i32, i32) {
    %c0_i32 = arith.constant 0 : i32
    return %arg0, %arg1 : i32, i32
  }
  func.func @transform_4(%arg0: i32, %arg1: i32) -> (i32, i32) {
    %c0_i32 = arith.constant 0 : i32
    return %arg0, %arg1 : i32, i32
  }
  func.func @transform_5(%arg0: i32, %arg1: i32) -> (i32, i32) {
    %c0_i32 = arith.constant 0 : i32
    return %arg0, %arg1 : i32, i32
  }
}

</mosaic_0001>

<bundles_post_ra>
// kernel: multibox_loss.1
= control target key start
LH: loop header
LB: loop body
LE: loop exit
PB: predicated region body
PF: predicated region fallthrough
CT: control target
= control target key end

     0   :  { %s1146_s18 = smov 0   ;;  %s1148_s19 = smov 0   ;;  %s1313_s0 = inlined_call_operand.vmem [shape: f32[13,2,512], index: 0, kind: input, shape index: {}]   ;;  %s1314_s1 = inlined_call_operand.vmem [shape: f32[4,2,512], index: 1, kind: input, shape index: {}]   ;;  %s1315_s2 = inlined_call_operand.vmem [shape: f32[8,2,512], index: 2, kind: input, shape index: {}]   ;;  %s1316_s3 = inlined_call_operand.vmem [shape: f32[2,512], index: 3, kind: output, shape index: {0}]   ;;  %s1317_s4 = inlined_call_operand.vmem [shape: f32[2,512], index: 4, kind: output, shape index: {1}]   ;;  %s1318_s5 = inlined_call_operand.vmem [shape: f32[2,512], index: 5, kind: output, shape index: {2}]  }
   0x1   :  { %s1150_s20 = smov 0   ;;  %s1152_s21 = smov 0  }
   0x2   :  { %s1154_s22 = smov 0  }
   0x3 LB: > { %s25_s23 = sadd.s32 1, %s1110_s21  ;;  %p44_p1 = scmp.ne.s32.totalorder %s1102_s19, %s1098_s18  ;;  %s1114_s22 = sphi %s1154_s22, %s16_s22   ;;  %s1110_s21 = sphi %s1152_s21, %s1330_s21   ;;  %s1106_s20 = sphi %s1150_s20, %s1329_s20   ;;  %s1102_s19 = sphi %s1148_s19, %s1328_s19   ;;  %s1098_s18 = sphi %s1146_s18, %s1327_s18  }
   0x4   : > { %p26_p0 = scmp.ge.s32.totalorder %s25_s23, 2  ;;  %p45_p2 = scmp.eq.s32.totalorder %s1114_s22, 0 }
   0x5   : > { %s37_s26 = sadd.s32 1, %s1102_s19  ;;  %p965_p5 = scmp.ge.s32.totalorder %s1114_s22, 2 }
   0x6   : > { %s1332_s23 = smov (%p26_p0, %s25_s23), 0  ;;  %p1177_p3 = por %p45_p2, %p44_p1 }
   0x7   : > { %s33_s25 = ssub.s32 %s1110_s21, %s1332_s23  ;;  %210 = sbr.rel (%p965_p5) target bundleno = 40 (0x28), region = 16 }
   0x8   : > { %p35_p4 = scmp.eq.s32.totalorder %s33_s25, 0 }
   0xa   : > { %s1185_s27 = scalar_select %p35_p4, %s1102_s19, %s37_s26  }
   0xc   : > { %213 = sbr.rel (!%p1177_p3) target bundleno = 25 (0x19), region = 20  ;;  %s215_s28 = sand.u32 (%p1177_p3), 1, %s1102_s19  }
   0xd   : > { %s1011_s29 = sshll.u32 (%p1177_p3), %s1110_s21, 2  ;;  %s1014_s30 = smul.u32 (%p1177_p3), 52, %s215_s28 }
   0xe   : > { %s222_s8 = scalar_lea.vmem (%p1177_p3), %s1313_s0, %s1011_s29 }
   0xf   : > { %v239_v0 = vld [vmem:[%s222_s8] sm:$0xf] (%p1177_p3)  ;;  %v241_v1 = vld [vmem:[%s222_s8 + $0x8] sm:$0xf] (%p1177_p3)  ;;  %v243_v2 = vld [vmem:[%s222_s8 + $0x10] sm:$0xf] (%p1177_p3) }
  0x10   : > { %v245_v3 = vld [vmem:[%s222_s8 + $0x18] sm:$0xf] (%p1177_p3)  ;;  %v247_v4 = vld [vmem:[%s222_s8 + $0x20] sm:$0xf] (%p1177_p3)  ;;  %s217_s9 = scalar_lea.vmem (%p1177_p3), [#allocation2], %s1014_s30 }
  0x11   : > { %240 = vst [vmem:[%s217_s9] sm:$0xf] %v239_v0  ;;  %242 = vst [vmem:[%s217_s9 + $0x4] sm:$0xf] %v241_v1  ;;  %v249_v5 = vld [vmem:[%s222_s8 + $0x28] sm:$0xf] }
  0x12   : > { %244 = vst [vmem:[%s217_s9 + $0x8] sm:$0xf] %v243_v2  ;;  %246 = vst [vmem:[%s217_s9 + $0xc] sm:$0xf] %v245_v3  ;;  %v251_v6 = vld [vmem:[%s222_s8 + $0x30] sm:$0xf] }
  0x13   : > { %248 = vst [vmem:[%s217_s9 + $0x10] sm:$0xf] %v247_v4  ;;  %v253_v7 = vld [vmem:[%s222_s8 + $0x38] sm:$0xf]  ;;  %250 = vst [vmem:[%s217_s9 + $0x14] sm:$0xf] %v249_v5 }
  0x14   : > { %252 = vst [vmem:[%s217_s9 + $0x18] sm:$0xf] %v251_v6  ;;  %254 = vst [vmem:[%s217_s9 + $0x1c] sm:$0xf] %v253_v7  ;;  %v255_v8 = vld [vmem:[%s222_s8 + $0x40] sm:$0xf] }
  0x15   : > { %v257_v9 = vld [vmem:[%s222_s8 + $0x48] sm:$0xf]  ;;  %v259_v10 = vld [vmem:[%s222_s8 + $0x50] sm:$0xf]  ;;  %256 = vst [vmem:[%s217_s9 + $0x20] sm:$0xf] %v255_v8 }
  0x16   : > { %258 = vst [vmem:[%s217_s9 + $0x24] sm:$0xf] %v257_v9  ;;  %260 = vst [vmem:[%s217_s9 + $0x28] sm:$0xf] %v259_v10  ;;  %v261_v11 = vld [vmem:[%s222_s8 + $0x58] sm:$0xf] }
  0x17   : > { %v263_v12 = vld [vmem:[%s222_s8 + $0x60] sm:$0xf]  ;;  %262 = vst [vmem:[%s217_s9 + $0x2c] sm:$0xf] %v261_v11 }
  0x18   : > { %264 = vst [vmem:[%s217_s9 + $0x30] sm:$0xf] %v263_v12 }
  0x19 PF: > { %314 = sbr.rel (!%p1177_p3) target bundleno = 31 (0x1f), region = 61  ;;  %s316_s10 = sand.u32 (%p1177_p3), 1, %s1102_s19  }
  0x1a   : > { %s1012_s11 = sshll.u32 (%p1177_p3), %s1110_s21, 2  ;;  %s968_s12 = sshll.u32 (%p1177_p3), %s316_s10, 4 }
  0x1b   : > { %s323_s15 = scalar_lea.vmem (%p1177_p3), %s1314_s1, %s1012_s11  ;;  %s318_s16 = scalar_lea.vmem (%p1177_p3), [#allocation3], %s968_s12 }
  0x1c   : > { %v340_v13 = vld [vmem:[%s323_s15] sm:$0xf] (%p1177_p3)  ;;  %v342_v14 = vld [vmem:[%s323_s15 + $0x8] sm:$0xf] (%p1177_p3)  ;;  %v344_v15 = vld [vmem:[%s323_s15 + $0x10] sm:$0xf] (%p1177_p3) }
  0x1d   : > { %341 = vst [vmem:[%s318_s16] sm:$0xf] (%p1177_p3), %v340_v13  ;;  %343 = vst [vmem:[%s318_s16 + $0x4] sm:$0xf] (%p1177_p3), %v342_v14  ;;  %v346_v16 = vld [vmem:[%s323_s15 + $0x18] sm:$0xf] (%p1177_p3) }
  0x1e   : > { %345 = vst [vmem:[%s318_s16 + $0x8] sm:$0xf] %v344_v15  ;;  %347 = vst [vmem:[%s318_s16 + $0xc] sm:$0xf] %v346_v16 }
  0x1f PF: > { %379 = sbr.rel (!%p1177_p3) target bundleno = 40 (0x28), region = 102  ;;  %s381_s17 = sand.u32 (%p1177_p3), 1, %s1102_s19  }
  0x20   : > { %s1013_s25 = sshll.u32 (%p1177_p3), %s1110_s21, 2  ;;  %s971_s26 = sshll.u32 (%p1177_p3), %s381_s17, 5 }
  0x21   : > { %s388_s30 = scalar_lea.vmem (%p1177_p3), %s1315_s2, %s1013_s25  ;;  %s383_s6 = scalar_lea.vmem (%p1177_p3), [#allocation4], %s971_s26 }
  0x22   : > { %v405_v17 = vld [vmem:[%s388_s30] sm:$0xf] (%p1177_p3)  ;;  %v407_v18 = vld [vmem:[%s388_s30 + $0x8] sm:$0xf] (%p1177_p3)  ;;  %v409_v19 = vld [vmem:[%s388_s30 + $0x10] sm:$0xf] (%p1177_p3) }
  0x23   : > { %406 = vst [vmem:[%s383_s6] sm:$0xf] (%p1177_p3), %v405_v17  ;;  %408 = vst [vmem:[%s383_s6 + $0x4] sm:$0xf] (%p1177_p3), %v407_v18  ;;  %v411_v20 = vld [vmem:[%s388_s30 + $0x18] sm:$0xf] (%p1177_p3) }
  0x24   : > { %v413_v21 = vld [vmem:[%s388_s30 + $0x20] sm:$0xf]  ;;  %410 = vst [vmem:[%s383_s6 + $0x8] sm:$0xf] %v409_v19  ;;  %412 = vst [vmem:[%s383_s6 + $0xc] sm:$0xf] %v411_v20 }
  0x25   : > { %414 = vst [vmem:[%s383_s6 + $0x10] sm:$0xf] %v413_v21  ;;  %v415_v22 = vld [vmem:[%s388_s30 + $0x28] sm:$0xf]  ;;  %v417_v23 = vld [vmem:[%s388_s30 + $0x30] sm:$0xf] }
  0x26   : > { %v419_v24 = vld [vmem:[%s388_s30 + $0x38] sm:$0xf]  ;;  %416 = vst [vmem:[%s383_s6 + $0x14] sm:$0xf] %v415_v22  ;;  %418 = vst [vmem:[%s383_s6 + $0x18] sm:$0xf] %v417_v23 }
  0x27   : > { %420 = vst [vmem:[%s383_s6 + $0x1c] sm:$0xf] %v419_v24 }
  0x28 PF: > { %p974_p6 = scmp.ge.s32.totalorder %s1114_s22, 1  ;;  %p459_p7 = scmp.lt.s32.totalorder %s1114_s22, 3 }
  0x2a   : > { %p460_p8 = pnand %p974_p6, %p459_p7 }
  0x2b   : > { %s466_s24 = sand.u32 (!%p460_p8), 1, %s1098_s18   ;;  %s977_s12 = sshll.u32 (!%p460_p8), %s1106_s20, 1 }
  0x2c   : > { %463 = sbr.rel (%p460_p8) target bundleno = 136 (0x88), region = 143  ;;  %s976_s7 = sshll.u32 (!%p460_p8), %s466_s24, 5 }
  0x2d   : > { %s482_s8 = scalar_lea.vmem (!%p460_p8), [#allocation4], %s976_s7  ;;  %s1015_s9 = smul.u32 (!%p460_p8), 52, %s466_s24 }
  0x2e   : > { %s975_s10 = sshll.u32 (!%p460_p8), %s466_s24, 4  ;;  %p1229_p9 = scmp.lt.s32.totalorder (!%p460_p8), %s977_s12, 3 }
  0x2f   : > { %s1212_s11 = scalar_lea.vmem (!%p460_p8), [#allocation2], %s1015_s9  ;;  %s475_s18 = scalar_lea.vmem (!%p460_p8), [#allocation3], %s975_s10 }
  0x31   : > { %v618_v25 = vld [vmem:[%s482_s8] sm:$0xf]  ;;  %v994_v26 = vld [vmem:[%s482_s8 + $0x4] sm:$0xf]  ;;  %v995_v28 = vld [vmem:[%s482_s8 + $0x8] sm:$0xf] }
  0x32   : > { %v621_v27 = vmax.f32 %v618_v25, %v994_v26  ;;  %v996_v29 = vld [vmem:[%s482_s8 + $0xc] sm:$0xf]  ;;  %v997_v31 = vld [vmem:[%s482_s8 + $0x10] sm:$0xf]  ;;  %v998_v33 = vld [vmem:[%s482_s8 + $0x14] sm:$0xf] }
  0x33   : > { %v572_v34 = vld [vmem:[%s1212_s11] sm:$0xf]  ;;  %v573_v36 = vld [vmem:[%s475_s18] sm:$0xf]  ;;  %v986_v38 = vld [vmem:[%s475_s18 + $0x4] sm:$0xf] }
  0x34   : > { %v624_v30 = vmax.f32 %v621_v27, %v995_v28  ;;  %v985_v37 = vld [vmem:[%s1212_s11 + $0x4] sm:$0xf]  ;;  %v999_v39 = vld [vmem:[%s482_s8 + $0x18] sm:$0xf]  ;;  %v574_v40 = vsub.f32 %v572_v34, %v573_v36  ;;  %v988_v42 = vld [vmem:[%s1212_s11 + $0x8] sm:$0xf] }
  0x35   : > { %v586_v41 = vsub.f32 %v985_v37, %v986_v38  ;;  %v989_v43 = vld [vmem:[%s475_s18 + $0x8] sm:$0xf]  ;;  %v1000_v45 = vld [vmem:[%s482_s8 + $0x1c] sm:$0xf]  ;;  %s1334_s12 = smov (!%p1229_p9, %s977_s12), 3 }
  0x36   : > { %v627_v32 = vmax.f32 %v624_v30, %v996_v29  ;;  %v598_v46 = vsub.f32 %v988_v42, %v989_v43  ;;  %v991_v47 = vld [vmem:[%s1212_s11 + $0xc] sm:$0xf]  ;;  %v992_v48 = vld [vmem:[%s475_s18 + $0xc] sm:$0xf]  ;;  %v575_v49 = vand.u32 2147483647, %v574_v40 }
  0x37   : > { %v577_v50 = vmul.f32 0.5, %v574_v40  ;;  %v587_v51 = vand.u32 2147483647, %v586_v41  ;;  %v589_v52 = vmul.f32 0.5, %v586_v41  ;;  %v610_v59 = vsub.f32 %v991_v47, %v992_v48  ;;  %s1265_s13 = sshll.u32 %s1334_s12, 1 }
  0x38   : > { %v630_v35 = vmax.f32 %v627_v32, %v997_v31  ;;  %v599_v54 = vand.u32 2147483647, %v598_v46  ;;  %v601_v55 = vmul.f32 0.5, %v598_v46  ;;  %vm1219_vm0 = vcmp.lt.f32.partialorder %v575_v49, 1.0  ;;  %s558_s16 = scalar_lea.vmem %s1317_s4, %s1265_s13  ;;  %v983_v30 = vld [vmem:[%s1212_s11 + $0x30] sm:$0xf]  ;;  %s568_s26 = scalar_lea.vmem %s1318_s5, %s1265_s13 }
  0x39   : > { %v578_v57 = vmul.f32 %v577_v50, %v574_v40  ;;  %v984_v58 = vadd.f32 -0.5, %v575_v49  ;;  %v590_v61 = vmul.f32 %v589_v52, %v586_v41  ;;  %v987_v62 = vadd.f32 -0.5, %v587_v51  ;;  %v1003_v0 = vld [vmem:[%s1212_s11 + $0x18] sm:$0xf]  ;;  %s548_s30 = scalar_lea.vmem %s1316_s3, %s1265_s13 }
  0x3a   : > { %v633_v44 = vmax.f32 %v630_v35, %v998_v33  ;;  %vm1225_vm1 = vcmp.lt.f32.partialorder %v587_v51, 1.0  ;;  %v602_v1 = vmul.f32 %v601_v55, %v598_v46  ;;  %v990_v2 = vadd.f32 -0.5, %v599_v54 }
  0x3b   : > { %v580_v63 = vsel %vm1219_vm0, %v578_v57, %v984_v58  ;;  %vm1243_vm2 = vcmp.lt.f32.partialorder %v599_v54, 1.0  ;;  %v611_v9 = vand.u32 2147483647, %v610_v59  ;;  %v592_v13 = vsel %vm1225_vm1, %v590_v61, %v987_v62  ;;  %v1001_v57 = vld [vmem:[%s1212_s11 + $0x10] sm:$0xf] }
  0x3c   : > { %v636_v53 = vmax.f32 %v633_v44, %v999_v39  ;;  %v593_v16 = vadd.f32 %v592_v13, %v580_v63  ;;  %v604_v17 = vsel %vm1243_vm2, %v602_v1, %v990_v2  ;;  %v613_v20 = vmul.f32 0.5, %v610_v59  ;;  %v1002_v58 = vld [vmem:[%s1212_s11 + $0x14] sm:$0xf] }
  0x3d   : > { %vm612_vm3 = vcmp.lt.f32.partialorder %v611_v9, 1.0  ;;  %v993_v22 = vadd.f32 -0.5, %v611_v9  ;;  %v727_v51 = vsub.f32 1.0, %v983_v30 }
  0x3e   : > { %v639_v60 = vmax.f32 %v636_v53, %v1000_v45  ;;  %v605_v21 = vadd.f32 %v604_v17, %v593_v16  ;;  %v1006_v16 = vld [vmem:[%s1212_s11 + $0x24] sm:$0xf] }
  0x40   : > { %v1233_v3 = vsub.f32 %v618_v25, %v639_v60  ;;  %v1235_v4 = vsub.f32 %v994_v26, %v639_v60  ;;  %v1237_v5 = vsub.f32 %v995_v28, %v639_v60  ;;  %v1239_v6 = vsub.f32 %v996_v29, %v639_v60 }
  0x41   : > { %v1241_v7 = vsub.f32 %v997_v31, %v639_v60  ;;  %v1253_v15 = vsub.f32 %v998_v33, %v639_v60  ;;  %v1260_v19 = vsub.f32 %v999_v39, %v639_v60  ;;  %v1263_v24 = vsub.f32 %v1000_v45, %v639_v60 }
  0x42   : > { %v641_v10 = vmul.f32 1.442695, %v1233_v3  ;;  %v644_v11 = vmul.f32 1.442695, %v1235_v4  ;;  %v648_v12 = vmul.f32 1.442695, %v1237_v5  ;;  %v614_v25 = vmul.f32 %v613_v20, %v610_v59 }
  0x43   : > { %v652_v14 = vmul.f32 1.442695, %v1239_v6  ;;  %v656_v18 = vmul.f32 1.442695, %v1241_v7  ;;  %v660_v23 = vmul.f32 1.442695, %v1253_v15 }
  0x44   : > { %1056 = vpow2.f32 %v641_v10  ;;  %v664_v26 = vmul.f32 1.442695, %v1260_v19  ;;  %v616_v27 = vsel %vm612_vm3, %v614_v25, %v993_v22  ;;  %v668_v29 = vmul.f32 1.442695, %v1263_v24  ;;  %v1005_v10 = vld [vmem:[%s1212_s11 + $0x20] sm:$0xf] }
  0x45   : > { %1058 = vpow2.f32 %v644_v11  ;;  %v617_v28 = vadd.f32 %v616_v27, %v605_v21  ;;  %v1007_v20 = vld [vmem:[%s1212_s11 + $0x28] sm:$0xf]  ;;  %v1008_v25 = vld [vmem:[%s1212_s11 + $0x2c] sm:$0xf] }
  0x46   : > { %1060 = vpow2.f32 %v648_v12 }
  0x47   : > { %1062 = vpow2.f32 %v652_v14  ;;  %v725_v31 = vmul.f32 %v983_v30, %v617_v28 }
  0x48   : > { %1064 = vpow2.f32 %v656_v18 }
  0x49   : > { %1066 = vpow2.f32 %v660_v23  ;;  %726 = vst [vmem:[%s558_s16] sm:$0xf] %v725_v31 }
  0x4a   : > { %1068 = vpow2.f32 %v664_v26 }
  0x4b   : > { %1070 = vpow2.f32 %v668_v29 }
  0x51   : > { %v1057_v32 = vpop.eup %1056 }
  0x52   : > { %v1059_v33 = vpop.eup %1058 }
  0x53   : > { %v1061_v34 = vpop.eup %1060  ;;  %v646_v35 = vadd.f32 %v1059_v33, %v1057_v32 }
  0x54   : > { %v1063_v36 = vpop.eup %1062 }
  0x55   : > { %v650_v37 = vadd.f32 %v1061_v34, %v646_v35  ;;  %v1065_v38 = vpop.eup %1064 }
  0x56   : > { %v1067_v40 = vpop.eup %1066 }
  0x57   : > { %v654_v39 = vadd.f32 %v1063_v36, %v650_v37  ;;  %v1069_v42 = vpop.eup %1068 }
  0x58   : > { %v1071_v44 = vpop.eup %1070 }
  0x59   : > { %v658_v41 = vadd.f32 %v1065_v38, %v654_v39 }
  0x5b   : > { %v662_v43 = vadd.f32 %v1067_v40, %v658_v41 }
  0x5d   : > { %v666_v45 = vadd.f32 %v1069_v42, %v662_v43 }
  0x5f   : > { %v670_v46 = vadd.f32 %v1071_v44, %v666_v45 }
  0x61   : > { %1072 = vlog2.f32 %v670_v46  ;;  %v722_v47 = vsub.f32 %v670_v46, %v1057_v32 }
  0x62   : > { %1074 = vrcp.f32 %v670_v46 }
  0x6e   : > { %v1073_v48 = vpop.eup %1072 }
  0x6f   : > { %v1075_v49 = vpop.eup %1074  ;;  %v672_v50 = vmul.f32 0.6931472, %v1073_v48 }
  0x70   : > { %v723_v52 = vmul.f32 %v1075_v49, %v722_v47 }
  0x71   : > { %v673_v53 = vsub.f32 %v1233_v3, %v672_v50  ;;  %v679_v54 = vsub.f32 %v1235_v4, %v672_v50  ;;  %v685_v55 = vsub.f32 %v1237_v5, %v672_v50  ;;  %v691_v56 = vsub.f32 %v1239_v6, %v672_v50  ;;  %v1004_v5 = vld [vmem:[%s1212_s11 + $0x1c] sm:$0xf] }
  0x72   : > { %v697_v59 = vsub.f32 %v1241_v7, %v672_v50  ;;  %v728_v63 = vmul.f32 %v727_v51, %v723_v52  ;;  %v703_v4 = vsub.f32 %v1253_v15, %v672_v50  ;;  %v709_v9 = vsub.f32 %v1260_v19, %v672_v50 }
  0x73   : > { %v676_v60 = vmax.f32 %v673_v53, -16.118095  ;;  %v682_v61 = vmax.f32 %v679_v54, -16.118095  ;;  %v688_v62 = vmax.f32 %v685_v55, -16.118095  ;;  %v715_v14 = vsub.f32 %v1263_v24, %v672_v50 }
  0x74   : > { %v694_v3 = vmax.f32 %v691_v56, -16.118095  ;;  %729 = vst [vmem:[%s568_s26] sm:$0xf] %v728_v63  ;;  %v700_v8 = vmax.f32 %v697_v59, -16.118095 }
  0x75   : > { %v677_v1 = vmul.f32 %v1001_v57, %v676_v60  ;;  %v683_v2 = vmul.f32 %v1002_v58, %v682_v61  ;;  %v689_v7 = vmul.f32 %v1003_v0, %v688_v62  ;;  %v706_v13 = vmax.f32 %v703_v4, -16.118095 }
  0x76   : > { %v695_v12 = vmul.f32 %v1004_v5, %v694_v3  ;;  %v701_v18 = vmul.f32 %v1005_v10, %v700_v8  ;;  %v712_v15 = vmax.f32 %v709_v9, -16.118095  ;;  %v718_v23 = vmax.f32 %v715_v14, -16.118095 }
  0x77   : > { %v678_v6 = vsub.f32 0.0, %v677_v1  ;;  %v707_v22 = vmul.f32 %v1006_v16, %v706_v13 }
  0x78   : > { %v713_v27 = vmul.f32 %v1007_v20, %v712_v15  ;;  %v719_v19 = vmul.f32 %v1008_v25, %v718_v23 }
  0x79   : > { %v684_v11 = vsub.f32 %v678_v6, %v683_v2 }
  0x7b   : > { %v690_v17 = vsub.f32 %v684_v11, %v689_v7 }
  0x7d   : > { %v696_v21 = vsub.f32 %v690_v17, %v695_v12 }
  0x7f   : > { %v702_v26 = vsub.f32 %v696_v21, %v701_v18 }
  0x81   : > { %v708_v28 = vsub.f32 %v702_v26, %v707_v22 }
  0x83   : > { %v714_v29 = vsub.f32 %v708_v28, %v713_v27 }
  0x85   : > { %v720_v30 = vsub.f32 %v714_v29, %v719_v19 }
  0x87   : > { %724 = vst [vmem:[%s548_s30] sm:$0xf] %v720_v30 }
  0x88 PF: > { %s16_s22 = sadd.s32 1, %s1114_s22   ;;  %s1327_s18 = smov %s1102_s19 }
  0x89   : > { %p13_p10 = scmp.ge.s32.totalorder %s16_s22, 4   ;;  %s1328_s19 = smov %s1185_s27 }
  0x8a   : > { %s1329_s20 = smov %s1110_s21  ;;  %s1330_s21 = smov %s1332_s23 }
  0x8b   :  { %15 = sbr.rel (!%p13_p10) target bundleno = 3 (0x3), region = 252 }

</bundles_post_ra>
